<compile_context>
chip_gen: v5e
topology: v5e:2x2
jax: 0.10.0
libtpu: 0.0.40
codegen_flags: <defaults>
</compile_context>

<pallas_src>
import functools
import math

import jax
import jax.numpy as jnp
from jax.experimental import pallas as pl
from jax.experimental.pallas import tpu as pltpu


def _label_smoothing_kernel(x_ref, t_ref, o_ref, *, row_tile, col_tile,
                            padding_idx, smooth_val, confidence):
    k = pl.program_id(1)                                 # vocab (reduction) block index

    tgt = t_ref[...]                                     # (TR, 1) int32 target ids
    tgt_local = tgt - k * col_tile                       # block offset folded into the target

    conf = jnp.float32(confidence)
    sval = jnp.float32(smooth_val)

    # (1, 128) lane iota, reused by every chunk (broadcasts against (TR, 1) targets).
    lane = jax.lax.broadcasted_iota(jnp.int32, (1, 128), 1)

    # Where the padding column lives (static chunk index, dynamic block gate).
    pad_block = padding_idx // col_tile
    pad_chunk = (padding_idx % col_tile) // 128
    pad_lane = padding_idx % 128
    in_pad_block = k == pad_block                        # traced scalar bool

    n_chunks = col_tile // 128

    # Stream x in 128-lane chunks; accumulate into a (TR, 128) lane-dense partial.
    lanes = None
    for j in range(n_chunks):
        x_c = x_ref[:, j * 128:(j + 1) * 128].astype(jnp.float32)   # (TR, 128)
        is_tgt = lane == (tgt_local - j * 128)                       # compare vs local iota
        cross = jnp.where(is_tgt, conf, sval) * x_c                  # select + mul
        if j == pad_chunk:
            # Zero the padding column's contribution. where() on the product is NaN-safe
            # even if x == -inf in that column (reference returns 0 there).
            pad_mask = jnp.logical_and(in_pad_block, lane == pad_lane)
            cross = jnp.where(pad_mask, jnp.float32(0.0), cross)
        lanes = cross if lanes is None else lanes + cross

    # Rows whose target is the padding index contribute nothing.
    # (where, not multiply -> NaN-safe if those rows contain -inf log-probs.)
    lanes = jnp.where(tgt != padding_idx, lanes, jnp.float32(0.0))

    # Fold sublanes TR -> 8 with a pairwise tree (log-depth chain of single-vreg adds).
    parts = [lanes[r * 8:(r + 1) * 8, :] for r in range(row_tile // 8)]
    while len(parts) > 1:
        nxt = [parts[a] + parts[a + 1] for a in range(0, len(parts) - 1, 2)]
        if len(parts) % 2:
            nxt.append(parts[-1])
        parts = nxt
    acc8 = parts[0]                                      # (8, 128) partial of sum(td * x)

    # Output block is resident across the vocab (reduction) axis: init once, accumulate.
    @pl.when(k == 0)
    def _():
        o_ref[...] = jnp.zeros_like(o_ref)

    o_ref[...] += acc8


def label_smoothing_loss(x, target, *, size, padding_idx, smoothing,
                         row_tile=256, col_tile=4096):
    """x: (N, V) log-probs (f32 or bf16), target: (N,) int. Returns scalar f32 sum-loss."""
    N, V = x.shape
    assert V == size, "x.shape[1] must equal size"
    assert size > 2, "smoothing/(size-2) requires size > 2"

    row_tile = min(row_tile, N)
    col_tile = min(col_tile, V)
    # Megacore (v7x): keep >= 2 row blocks so the "parallel" axis shards across TensorCores.
    if N // row_tile < 2 and N % 16 == 0:
        row_tile = min(row_tile, N // 2)
    assert N % row_tile == 0 and row_tile % 8 == 0, "N must tile by row_tile (mult. of 8)"
    assert V % col_tile == 0 and col_tile % 128 == 0, "V must tile by col_tile (mult. of 128)"

    confidence = 1.0 - smoothing
    smooth_val = smoothing / (size - 2)
    # Per non-pad row:  sum_c td*log(td) = conf*log(conf) + (V-2)*s*log(s)   (0*log0 := 0)
    entropy_const = 0.0
    if confidence > 0.0:
        entropy_const += confidence * math.log(confidence)
    if smooth_val > 0.0:
        entropy_const += (size - 2) * smooth_val * math.log(smooth_val)

    t2d = target.astype(jnp.int32).reshape(N, 1)
    num_row_blocks = N // row_tile
    num_col_blocks = V // col_tile

    kernel = functools.partial(
        _label_smoothing_kernel,
        row_tile=row_tile, col_tile=col_tile,
        padding_idx=int(padding_idx),
        smooth_val=float(smooth_val),
        confidence=float(confidence))

    # Double-buffered x blocks + target/output blocks + headroom; cap well under the
    # smallest physical VMEM (v7x: 64 MiB).
    block_bytes = row_tile * col_tile * jnp.dtype(x.dtype).itemsize
    vmem_limit = int(min(max(2 * block_bytes + (8 << 20), 16 << 20), 48 << 20))

    partials = pl.pallas_call(
        kernel,
        out_shape=jax.ShapeDtypeStruct((num_row_blocks * 8, 128), jnp.float32),
        grid_spec=pltpu.PrefetchScalarGridSpec(
            num_scalar_prefetch=0,
            grid=(num_row_blocks, num_col_blocks),        # reduction (vocab) axis last
            in_specs=[
                pl.BlockSpec((row_tile, col_tile), lambda i, k: (i, k)),
                pl.BlockSpec((row_tile, 1), lambda i, k: (i, 0)),
            ],
            out_specs=pl.BlockSpec((8, 128), lambda i, k: (i, 0)),
        ),
        compiler_params=pltpu.CompilerParams(
            dimension_semantics=("parallel", "arbitrary"),
            vmem_limit_bytes=vmem_limit),
    )(x, t2d)

    n_nonpad = jnp.sum((target != padding_idx).astype(jnp.float32))
    return jnp.float32(entropy_const) * n_nonpad - jnp.sum(partials)


def _reference_loss(x, target, *, size, padding_idx, smoothing):
    """Pure-JAX reference, literal transcription of the PyTorch module."""
    confidence = 1.0 - smoothing
    N, V = x.shape
    td = jnp.full((N, V), smoothing / (size - 2), dtype=jnp.float32)
    td = td.at[jnp.arange(N), target].set(confidence)
    td = td.at[:, padding_idx].set(0.0)
    td = jnp.where((target == padding_idx)[:, None], 0.0, td)
    contrib = jnp.where(td > 0, td * (jnp.log(jnp.maximum(td, 1e-30)) - x), 0.0)
    return jnp.sum(contrib)


if __name__ == "__main__":
    SIZE = 1024          # vocab size ("size" arg of LabelSmoothing)
    N = 512              # number of tokens (batch * seq), e.g. batch=16, seq=32

    key = jax.random.PRNGKey(0)
    k_x, k_t = jax.random.split(key)

    logits = jax.random.normal(k_x, (N, SIZE), dtype=jnp.float32)
    x_f32 = jax.nn.log_softmax(logits, axis=-1)            # KLDivLoss expects log-probs
    x_bf16 = x_f32.astype(jnp.bfloat16)                    # stream x in bf16 (half the HBM bytes)
    target = jax.random.randint(k_t, (N,), 0, SIZE, dtype=jnp.int32)

    # --- Config A: bf16 input, padding_idx=0, some padded rows, 2-D grid exercised ---
    PAD_A, SM_A = 0, 0.1
    tgt_a = target.at[::7].set(PAD_A)
    loss_a = label_smoothing_loss(
        x_bf16, tgt_a, size=SIZE, padding_idx=PAD_A, smoothing=SM_A,
        row_tile=128, col_tile=512)
    loss_a = jax.block_until_ready(loss_a)
    ref_a = _reference_loss(x_bf16.astype(jnp.float32), tgt_a,
                            size=SIZE, padding_idx=PAD_A, smoothing=SM_A)
    assert jnp.allclose(loss_a, ref_a, rtol=1e-3, atol=1e-1), (loss_a, ref_a)

    # --- Config B: f32 input, padding column in a non-zero vocab block / non-zero chunk ---
    PAD_B, SM_B = 700, 0.2
    tgt_b = target.at[::11].set(PAD_B)
    loss_b = label_smoothing_loss(
        x_f32, tgt_b, size=SIZE, padding_idx=PAD_B, smoothing=SM_B,
        row_tile=64, col_tile=256)
    loss_b = jax.block_until_ready(loss_b)
    ref_b = _reference_loss(x_f32, tgt_b, size=SIZE, padding_idx=PAD_B, smoothing=SM_B)
    assert jnp.allclose(loss_b, ref_b, rtol=1e-3, atol=1e-1), (loss_b, ref_b)

    print("KERNEL_OK")
</pallas_src>

<mosaic_0001>
module attributes {stable_mosaic.version = 11 : i64} {
  func.func @_label_smoothing_kernel(%arg0: i32, %arg1: i32, %arg2: memref<128x512xbf16, #tpu.memory_space<vmem>>, %arg3: memref<128x1xi32, #tpu.memory_space<vmem>>, %arg4: memref<8x128xf32, #tpu.memory_space<vmem>>) attributes {dimension_semantics = [#tpu.dimension_semantics<parallel>, #tpu.dimension_semantics<arbitrary>], iteration_bounds = array<i64: 4, 2>, scalar_prefetch = 0 : i64, scratch_operands = 0 : i64, tpu.core_type = #tpu.core_type<tc>, window_params = [{transform_indices = @transform_0, window_bounds = array<i64: 128, 512>}, {transform_indices = @transform_1, window_bounds = array<i64: 128, 1>}, {transform_indices = @transform_2, window_bounds = array<i64: 8, 128>}]} {
    %c0 = arith.constant 0 : index
    %c0_0 = arith.constant 0 : index
    %0 = vector.load %arg3[%c0, %c0_0] : memref<128x1xi32, #tpu.memory_space<vmem>>, vector<128x1xi32>
    %c512_i32 = arith.constant 512 : i32
    %1 = arith.muli %arg1, %c512_i32 : i32
    %2 = vector.broadcast %1 : i32 to vector<128x1xi32>
    %3 = arith.subi %0, %2 : vector<128x1xi32>
    %4 = tpu.iota {dimensions = array<i32: 1>} : vector<1x128xi32>
    %c0_i32 = arith.constant 0 : i32
    %5 = arith.cmpi eq, %arg1, %c0_i32 : i32
    %c0_1 = arith.constant 0 : index
    %c0_2 = arith.constant 0 : index
    %6 = vector.load %arg2[%c0_1, %c0_2] : memref<128x512xbf16, #tpu.memory_space<vmem>>, vector<128x128xbf16>
    %7 = arith.extf %6 : vector<128x128xbf16> to vector<128x128xf32>
    %c0_i32_3 = arith.constant 0 : i32
    %8 = vector.broadcast %c0_i32_3 : i32 to vector<128x1xi32>
    %9 = arith.subi %3, %8 : vector<128x1xi32>
    %10 = vector.broadcast %4 : vector<1x128xi32> to vector<128x128xi32>
    %11 = vector.broadcast %9 : vector<128x1xi32> to vector<128x128xi32>
    %12 = arith.cmpi eq, %10, %11 : vector<128x128xi32>
    %cst = arith.constant 0.899999976 : f32
    %cst_4 = arith.constant 9.78473617E-5 : f32
    %13 = vector.broadcast %cst : f32 to vector<128x128xf32>
    %14 = vector.broadcast %cst_4 : f32 to vector<128x128xf32>
    %15 = arith.select %12, %13, %14 : vector<128x128xi1>, vector<128x128xf32>
    %16 = arith.mulf %15, %7 : vector<128x128xf32>
    %c0_i32_5 = arith.constant 0 : i32
    %17 = vector.broadcast %c0_i32_5 : i32 to vector<1x128xi32>
    %18 = arith.cmpi eq, %4, %17 : vector<1x128xi32>
    %19 = vector.broadcast %5 : i1 to vector<1x128xi1>
    %20 = arith.andi %19, %18 : vector<1x128xi1>
    %cst_6 = arith.constant 0.000000e+00 : f32
    %21 = vector.shape_cast %20 : vector<1x128xi1> to vector<1x128xi1>
    %22 = vector.broadcast %21 : vector<1x128xi1> to vector<128x128xi1>
    %23 = vector.broadcast %cst_6 : f32 to vector<128x128xf32>
    %24 = arith.select %22, %23, %16 : vector<128x128xi1>, vector<128x128xf32>
    %c0_7 = arith.constant 0 : index
    %c128 = arith.constant 128 : index
    %25 = vector.load %arg2[%c0_7, %c128] : memref<128x512xbf16, #tpu.memory_space<vmem>>, vector<128x128xbf16>
    %26 = arith.extf %25 : vector<128x128xbf16> to vector<128x128xf32>
    %c128_i32 = arith.constant 128 : i32
    %27 = vector.broadcast %c128_i32 : i32 to vector<128x1xi32>
    %28 = arith.subi %3, %27 : vector<128x1xi32>
    %29 = vector.broadcast %4 : vector<1x128xi32> to vector<128x128xi32>
    %30 = vector.broadcast %28 : vector<128x1xi32> to vector<128x128xi32>
    %31 = arith.cmpi eq, %29, %30 : vector<128x128xi32>
    %cst_8 = arith.constant 0.899999976 : f32
    %cst_9 = arith.constant 9.78473617E-5 : f32
    %32 = vector.broadcast %cst_8 : f32 to vector<128x128xf32>
    %33 = vector.broadcast %cst_9 : f32 to vector<128x128xf32>
    %34 = arith.select %31, %32, %33 : vector<128x128xi1>, vector<128x128xf32>
    %35 = arith.mulf %34, %26 : vector<128x128xf32>
    %36 = arith.addf %24, %35 : vector<128x128xf32>
    %c0_10 = arith.constant 0 : index
    %c256 = arith.constant 256 : index
    %37 = vector.load %arg2[%c0_10, %c256] : memref<128x512xbf16, #tpu.memory_space<vmem>>, vector<128x128xbf16>
    %38 = arith.extf %37 : vector<128x128xbf16> to vector<128x128xf32>
    %c256_i32 = arith.constant 256 : i32
    %39 = vector.broadcast %c256_i32 : i32 to vector<128x1xi32>
    %40 = arith.subi %3, %39 : vector<128x1xi32>
    %41 = vector.broadcast %4 : vector<1x128xi32> to vector<128x128xi32>
    %42 = vector.broadcast %40 : vector<128x1xi32> to vector<128x128xi32>
    %43 = arith.cmpi eq, %41, %42 : vector<128x128xi32>
    %cst_11 = arith.constant 0.899999976 : f32
    %cst_12 = arith.constant 9.78473617E-5 : f32
    %44 = vector.broadcast %cst_11 : f32 to vector<128x128xf32>
    %45 = vector.broadcast %cst_12 : f32 to vector<128x128xf32>
    %46 = arith.select %43, %44, %45 : vector<128x128xi1>, vector<128x128xf32>
    %47 = arith.mulf %46, %38 : vector<128x128xf32>
    %48 = arith.addf %36, %47 : vector<128x128xf32>
    %c0_13 = arith.constant 0 : index
    %c384 = arith.constant 384 : index
    %49 = vector.load %arg2[%c0_13, %c384] : memref<128x512xbf16, #tpu.memory_space<vmem>>, vector<128x128xbf16>
    %50 = arith.extf %49 : vector<128x128xbf16> to vector<128x128xf32>
    %c384_i32 = arith.constant 384 : i32
    %51 = vector.broadcast %c384_i32 : i32 to vector<128x1xi32>
    %52 = arith.subi %3, %51 : vector<128x1xi32>
    %53 = vector.broadcast %4 : vector<1x128xi32> to vector<128x128xi32>
    %54 = vector.broadcast %52 : vector<128x1xi32> to vector<128x128xi32>
    %55 = arith.cmpi eq, %53, %54 : vector<128x128xi32>
    %cst_14 = arith.constant 0.899999976 : f32
    %cst_15 = arith.constant 9.78473617E-5 : f32
    %56 = vector.broadcast %cst_14 : f32 to vector<128x128xf32>
    %57 = vector.broadcast %cst_15 : f32 to vector<128x128xf32>
    %58 = arith.select %55, %56, %57 : vector<128x128xi1>, vector<128x128xf32>
    %59 = arith.mulf %58, %50 : vector<128x128xf32>
    %60 = arith.addf %48, %59 : vector<128x128xf32>
    %c0_i32_16 = arith.constant 0 : i32
    %61 = vector.broadcast %c0_i32_16 : i32 to vector<128x1xi32>
    %62 = arith.cmpi ne, %0, %61 : vector<128x1xi32>
    %cst_17 = arith.constant 0.000000e+00 : f32
    %63 = vector.shape_cast %62 : vector<128x1xi1> to vector<128x1xi1>
    %64 = vector.broadcast %63 : vector<128x1xi1> to vector<128x128xi1>
    %65 = vector.broadcast %cst_17 : f32 to vector<128x128xf32>
    %66 = arith.select %64, %60, %65 : vector<128x128xi1>, vector<128x128xf32>
    %67 = vector.extract_strided_slice %66 {offsets = [0, 0], sizes = [8, 128], strides = [1, 1]} : vector<128x128xf32> to vector<8x128xf32>
    %68 = vector.extract_strided_slice %66 {offsets = [8, 0], sizes = [8, 128], strides = [1, 1]} : vector<128x128xf32> to vector<8x128xf32>
    %69 = vector.extract_strided_slice %66 {offsets = [16, 0], sizes = [8, 128], strides = [1, 1]} : vector<128x128xf32> to vector<8x128xf32>
    %70 = vector.extract_strided_slice %66 {offsets = [24, 0], sizes = [8, 128], strides = [1, 1]} : vector<128x128xf32> to vector<8x128xf32>
    %71 = vector.extract_strided_slice %66 {offsets = [32, 0], sizes = [8, 128], strides = [1, 1]} : vector<128x128xf32> to vector<8x128xf32>
    %72 = vector.extract_strided_slice %66 {offsets = [40, 0], sizes = [8, 128], strides = [1, 1]} : vector<128x128xf32> to vector<8x128xf32>
    %73 = vector.extract_strided_slice %66 {offsets = [48, 0], sizes = [8, 128], strides = [1, 1]} : vector<128x128xf32> to vector<8x128xf32>
    %74 = vector.extract_strided_slice %66 {offsets = [56, 0], sizes = [8, 128], strides = [1, 1]} : vector<128x128xf32> to vector<8x128xf32>
    %75 = vector.extract_strided_slice %66 {offsets = [64, 0], sizes = [8, 128], strides = [1, 1]} : vector<128x128xf32> to vector<8x128xf32>
    %76 = vector.extract_strided_slice %66 {offsets = [72, 0], sizes = [8, 128], strides = [1, 1]} : vector<128x128xf32> to vector<8x128xf32>
    %77 = vector.extract_strided_slice %66 {offsets = [80, 0], sizes = [8, 128], strides = [1, 1]} : vector<128x128xf32> to vector<8x128xf32>
    %78 = vector.extract_strided_slice %66 {offsets = [88, 0], sizes = [8, 128], strides = [1, 1]} : vector<128x128xf32> to vector<8x128xf32>
    %79 = vector.extract_strided_slice %66 {offsets = [96, 0], sizes = [8, 128], strides = [1, 1]} : vector<128x128xf32> to vector<8x128xf32>
    %80 = vector.extract_strided_slice %66 {offsets = [104, 0], sizes = [8, 128], strides = [1, 1]} : vector<128x128xf32> to vector<8x128xf32>
    %81 = vector.extract_strided_slice %66 {offsets = [112, 0], sizes = [8, 128], strides = [1, 1]} : vector<128x128xf32> to vector<8x128xf32>
    %82 = vector.extract_strided_slice %66 {offsets = [120, 0], sizes = [8, 128], strides = [1, 1]} : vector<128x128xf32> to vector<8x128xf32>
    %83 = arith.addf %67, %68 : vector<8x128xf32>
    %84 = arith.addf %69, %70 : vector<8x128xf32>
    %85 = arith.addf %71, %72 : vector<8x128xf32>
    %86 = arith.addf %73, %74 : vector<8x128xf32>
    %87 = arith.addf %75, %76 : vector<8x128xf32>
    %88 = arith.addf %77, %78 : vector<8x128xf32>
    %89 = arith.addf %79, %80 : vector<8x128xf32>
    %90 = arith.addf %81, %82 : vector<8x128xf32>
    %91 = arith.addf %83, %84 : vector<8x128xf32>
    %92 = arith.addf %85, %86 : vector<8x128xf32>
    %93 = arith.addf %87, %88 : vector<8x128xf32>
    %94 = arith.addf %89, %90 : vector<8x128xf32>
    %95 = arith.addf %91, %92 : vector<8x128xf32>
    %96 = arith.addf %93, %94 : vector<8x128xf32>
    %97 = arith.addf %95, %96 : vector<8x128xf32>
    %c0_i32_18 = arith.constant 0 : i32
    %98 = arith.cmpi eq, %arg1, %c0_i32_18 : i32
    %99 = arith.extui %98 : i1 to i32
    %c0_i32_19 = arith.constant 0 : i32
    %100 = arith.cmpi ne, %99, %c0_i32_19 : i32
    scf.if %100 {
      %cst_24 = arith.constant 0.000000e+00 : f32
      %104 = vector.broadcast %cst_24 : f32 to vector<8x128xf32>
      %c0_25 = arith.constant 0 : index
      %c0_26 = arith.constant 0 : index
      %105 = vector.load %arg4[%c0_25, %c0_26] : memref<8x128xf32, #tpu.memory_space<vmem>>, vector<8x128xf32>
      tpu.vector_store %arg4[%c0_25, %c0_26], %104 {strides = array<i32>} : memref<8x128xf32, #tpu.memory_space<vmem>>, vector<8x128xf32>,
    } else {
    }
    %c0_20 = arith.constant 0 : index
    %c0_21 = arith.constant 0 : index
    %101 = vector.load %arg4[%c0_20, %c0_21] : memref<8x128xf32, #tpu.memory_space<vmem>>, vector<8x128xf32>
    %102 = arith.addf %101, %97 : vector<8x128xf32>
    %c0_22 = arith.constant 0 : index
    %c0_23 = arith.constant 0 : index
    %103 = vector.load %arg4[%c0_22, %c0_23] : memref<8x128xf32, #tpu.memory_space<vmem>>, vector<8x128xf32>
    tpu.vector_store %arg4[%c0_22, %c0_23], %102 {strides = array<i32>} : memref<8x128xf32, #tpu.memory_space<vmem>>, vector<8x128xf32>,
    return
  }
  func.func @transform_0(%arg0: i32, %arg1: i32) -> (i32, i32) {
    %c0_i32 = arith.constant 0 : i32
    return %arg0, %arg1 : i32, i32
  }
  func.func @transform_1(%arg0: i32, %arg1: i32) -> (i32, i32) {
    %c0_i32 = arith.constant 0 : i32
    %c0_i32_0 = arith.constant 0 : i32
    return %arg0, %c0_i32 : i32, i32
  }
  func.func @transform_2(%arg0: i32, %arg1: i32) -> (i32, i32) {
    %c0_i32 = arith.constant 0 : i32
    %c0_i32_0 = arith.constant 0 : i32
    return %arg0, %c0_i32 : i32, i32
  }
}

</mosaic_0001>

<bundles_post_ra>
// kernel: tpu_custom_call.1
= control target key start
LH: loop header
LB: loop body
LE: loop exit
PB: predicated region body
PF: predicated region fallthrough
CT: control target
= control target key end

     0   :  { %7 = vsyncpa [#allocation3], 0  ;;  %s2336_s0 = inlined_call_operand.hbm [shape: bf16[512,1024], index: 0, kind: input, shape index: {}]   ;;  %s2337_s1 = inlined_call_operand.vmem [shape: s32[512,1], index: 1, kind: input, shape index: {}]   ;;  %s2338_s2 = inlined_call_operand.hbm [shape: f32[32,128], index: 2, kind: output, shape index: {}]  }
   0x1   :  { %9 = vsyncpa [#allocation3 + $0x1], 0 }
   0x2   :  { %10 = vsyncpa [#allocation4], 0 }
   0x3   :  { %12 = vsyncpa [#allocation4 + $0x1], 0  ;;  %s1474_s9 = smov 0   ;;  %s1476_s10 = smov 0  }
   0x4   :  { %s1478_s11 = smov 0   ;;  %s1480_s12 = smov 0  }
   0x5   :  { %s1482_s13 = smov 0   ;;  %s1484_s14 = smov 0  }
   0x6   :  { %s1486_s15 = smov 0   ;;  %s1488_s16 = smov 0  }
   0x7   :  { %s1490_s17 = smov 0   ;;  %s1492_s18 = smov 0  }
   0x8   :  { %s1494_s19 = smov 0  }
   0x9 LB: > { %2343 = sst [smem:[#allocation8_spill]] %s1431_s14  ;;  %s1119_s20 = sadd.s32 4294967295, %s1451_s19   ;;  %s1451_s19 = sphi %s1494_s19, %s18_s19   ;;  %s1447_s18 = sphi %s1492_s18, %s2367_s18   ;;  %s1443_s17 = sphi %s1490_s17, %s2359_s17   ;;  %s1439_s16 = sphi %s1488_s16, %s2366_s16   ;;  %s1435_s15 = sphi %s1486_s15, %s2358_s15   ;;  %s1431_s14 = sphi %s1484_s14, %s2357_s14   ;;  %s1427_s13 = sphi %s1482_s13, %s2365_s13   ;;  %s1423_s12 = sphi %s1480_s12, %s2364_s12   ;;  %s1419_s11 = sphi %s1478_s11, %s2363_s11   ;;  %s1415_s10 = sphi %s1476_s10, %s2362_s10   ;;  %s1411_s9 = sphi %s1474_s9, %s2361_s9  }
   0xa   : > { %2344 = sst [smem:[#allocation9_spill]] %s1443_s17  ;;  %s1120_s21 = sadd.s32 4294967294, %s1451_s19  }
   0xb   : > { %s27_s22 = sadd.s32 1, %s1443_s17  ;;  %s30_s23 = sadd.s32 1, %s1447_s18 }
   0xc   : > { %p28_p0 = scmp.ge.s32.totalorder %s27_s22, 2  ;;  %s39_s24 = sadd.s32 1, %s1431_s14 }
   0xd   : > { %p46_p1 = scmp.ne.s32.totalorder %s1431_s14, %s1427_s13  ;;  %p47_p2 = scmp.eq.s32.totalorder %s1451_s19, 0 }
   0xe   : > { %s2369_s22 = smov (%p28_p0, %s27_s22), 0  ;;  %s2371_s23 = smov (!%p28_p0, %s30_s23), %s1447_s18 }
   0xf   : > { %2345 = sst [smem:[#allocation10_spill]] %s2369_s22  ;;  %s35_s25 = ssub.s32 %s1443_s17, %s2369_s22 }
  0x10   : > { %p1540_p3 = por %p47_p2, %p46_p1  ;;  %p32_p4 = scmp.ge.s32.totalorder %s2371_s23, 4 }
  0x11   : > { %p52_p5 = scmp.ne.s32.totalorder %s1427_s13, %s1423_s12  ;;  %p53_p6 = scmp.eq.s32.totalorder %s1119_s20, 0 }
  0x12   : > { %s91_s27 = sadd.s32 1, %s1419_s11  ;;  %s2373_s23 = smov (%p32_p4, %s2371_s23), 0 }
  0x13   : > { %2347 = sst [smem:[#allocation11_spill]] %s2373_s23  ;;  %p1548_p7 = por %p53_p6, %p52_p5 }
  0x14   : > { %p101_p8 = scmp.ne.s32.totalorder %s1419_s11, %s1415_s10  ;;  %s34_s29 = ssub.s32 %s1447_s18, %s2373_s23 }
  0x15   : > { %p102_p9 = scmp.eq.s32.totalorder %s1119_s20, 7  ;;  %s36_s30 = sor.u32 %s35_s25, %s34_s29 }
  0x16   : > { %p89_p10 = scmp.eq.s32.totalorder %s34_s29, 0  ;;  %p37_p11 = scmp.eq.s32.totalorder %s36_s30, 0 }
  0x17   : > { %p1556_p12 = por %p102_p9, %p101_p8  ;;  %p107_p13 = scmp.ne.s32.totalorder %s1415_s10, %s1411_s9 }
  0x18   : > { %s1561_s4 = scalar_select %p89_p10, %s1419_s11, %s91_s27  }
  0x19   : > { %s1564_s5 = scalar_select %p37_p11, %s1431_s14, %s39_s24  }
  0x1a   : > { %2350 = sst [smem:[#allocation12_spill]] %s1561_s4  ;;  %p108_p0 = scmp.eq.s32.totalorder %s1120_s21, 7 }
  0x1b   : > { %2351 = sst [smem:[#allocation13_spill]] %s1564_s5  ;;  %p1200_p1 = scmp.lt.s32.totalorder %s1451_s19, 8 }
  0x1c   : > { %p1569_p2 = por %p108_p0, %p107_p13  ;;  %s128_s7 = sand.u32 1, %s1431_s14  }
  0x1d   : > { %s1123_s8 = sshll.u32 %s128_s7, 8  ;;  %s1125_s12 = sshll.u32 %s1443_s17, 2 }
  0x1e   : > { %s1187_s20 = sshll.u32 %s1447_s18, 7  ;;  %s132_s25 = scalar_lea.vmem [#allocation2], %s1123_s8 }
  0x1f   : > { %s143_s29 = sshll.u32 %s132_s25, 4  ;;  %s138_s30 = sadd.s32 %s1187_s20, %s1125_s12  ;;  %s144_s29 = int_to_ptr.vmem [resolvable:$true] %s143_s29 }
  0x20   : > { %s1127_s27 = sshll.u32 %s138_s30, 2  ;;  %p1193_p4 = pnand %p1200_p1, %p1540_p3 }
  0x21   : > { %s140_s23 = scalar_lea.hbm %s2336_s0, %s1127_s27  ;;  %p1128_p5 = scmp.ge.s32.totalorder %s1451_s19, 1 }
  0x22   : > { %s141_s22 = sshll.u32 %s140_s23, 4  ;;  %s129_s5 = scalar_lea.sflag [#allocation3], %s128_s7  ;;  %s142_s22 = int_to_ptr.hbm [resolvable:$true] %s141_s22 }
  0x23   : > { %s1453_s14 = smov 512   ;;  %s1454_s4 = smov 256  }
  0x24   : > { %s1455_s17 = smov 16   ;;  %p160_p6 = scmp.lt.s32.totalorder %s1451_s19, 9 }
  0x25   : > { %1195 = dma.hbm_to_vmem [thread:$0]  (!%p1193_p4), %s142_s22, 4096, %s144_s29, %s129_s5, %s1453_s14, %s1454_s4, %s1455_s17  }
  0x26   : > { %p161_p8 = pnand %p1128_p5, %p160_p6 }
  0x27   : > { %s166_s8 = sand.u32 (!%p161_p8), 1, %s1427_s13  }
  0x28   : > { %164 = sbr.rel (%p161_p8) target bundleno = 405 (0x195), region = 28  ;;  %s1129_s26 = sshll.u32 (!%p161_p8), %s166_s8, 8 }
  0x29   : > { %s167_s12 = scalar_lea.sflag (!%p161_p8), [#allocation3], %s166_s8  ;;  %s1584_s20 = scalar_lea.vmem (!%p161_p8), [#allocation2], %s1129_s26 }
  0x2d   : > { %1402 = dma.done.wait (%p1548_p7), %s167_s12, 4096  }
  0x2e   : > { %1404 = vsyncadd (%p1548_p7), %s167_s12, 4294963200  ;;  %s1131_s23 = sshll.u32 %s1439_s16, 4  ;;  %v1456_v0 = vmov 0   ;;  %s1133_s14 = sshll.u32 %s1435_s15, 9 }
  0x2f   : > { %1298 = vset.pattern.permute.xlu2 %v1456_v0  ;;  %1297 = vset.pattern.permute.xlu1 %v1456_v0  ;;  %p200_p3 = scmp.lt.s32.totalorder %s1131_s23, 63  ;;  %v222_v1 = vstv %s1133_s14  ;;  %p241_p7 = scmp.eq.s32.totalorder %s1435_s15, 0 }
  0x30   : > { %1296 = vset.pattern.permute.xlu0 %v1456_v0  ;;  %s194_s7 = sand.u32 1, %s1415_s10   ;;  %p1182_p9 = scmp.ne.s32.totalorder %s1435_s15, 0 }
  0x31   : > { %s2375_s23 = smov (!%p200_p3, %s1131_s23), 63  ;;  %s2096_s25 = sshll.u32 %s194_s7, 3 }
  0x32   : > { %s1132_s17 = sshll.u32 %s2375_s23, 3  ;;  %s196_s29 = scalar_lea.vmem [#allocation5], %s2096_s25 }
  0x33   : > { %s1598_s28 = scalar_lea.vmem %s2337_s1, %s1132_s17 }
  0x34   : > { %v1601_v2 = vld [vmem:[%s1598_s28 + $0x20] sm:$0xff]  ;;  %v1604_v3 = vld [vmem:[%s1598_s28 + $0x10] sm:$0xff]  ;;  %v1622_v8 = vld [vmem:[%s1598_s28 + $0x28] sm:$0xff]  ;;  %s371_s5 = scalar_select %p241_p7, 1, 0 }
  0x35   : > { %v1607_v4 = vld [vmem:[%s1598_s28] sm:$0xff]  ;;  %v1610_v5 = vsub.s32 %v1601_v2, %v222_v1  ;;  %v1613_v6 = vsub.s32 %v1604_v3, %v222_v1  ;;  %v1625_v9 = vld [vmem:[%s1598_s28 + $0x18] sm:$0xff]  ;;  %v1628_v10 = vld [vmem:[%s1598_s28 + $0x8] sm:$0xff]  ;;  %v1631_v11 = vsub.s32 %v1622_v8, %v222_v1 }
  0x36   : > { %v1616_v7 = vsub.s32 %v1607_v4, %v222_v1  ;;  %v1634_v12 = vsub.s32 %v1625_v9, %v222_v1  ;;  %v1637_v13 = vsub.s32 %v1628_v10, %v222_v1  ;;  %v1643_v14 = vld [vmem:[%s1598_s28 + $0x40] sm:$0xff]  ;;  %v1646_v15 = vld [vmem:[%s1598_s28 + $0x38] sm:$0xff]  ;;  %v1649_v16 = vld [vmem:[%s1598_s28 + $0x30] sm:$0xff] }
  0x37   : > { %287 = vperm.xlu2 %1298, %v1610_v5   ;;  %281 = vperm.xlu1 %1297, %v1613_v6   ;;  %v1652_v17 = vsub.s32 %v1643_v14, %v222_v1  ;;  %v1655_v18 = vsub.s32 %v1646_v15, %v222_v1  ;;  %v1658_v19 = vsub.s32 %v1649_v16, %v222_v1  ;;  %v1664_v20 = vld [vmem:[%s1598_s28 + $0x58] sm:$0xff]  ;;  %v1667_v21 = vld [vmem:[%s1598_s28 + $0x50] sm:$0xff]  ;;  %v1670_v22 = vld [vmem:[%s1598_s28 + $0x48] sm:$0xff]  ;;  %v1138_v36 = vadd.s32 4294967168, %v1610_v5 }
  0x38   : > { %275 = vperm.xlu0 %1296, %v1616_v7   ;;  %v1673_v23 = vsub.s32 %v1664_v20, %v222_v1  ;;  %v1676_v24 = vsub.s32 %v1667_v21, %v222_v1  ;;  %v1679_v25 = vsub.s32 %v1670_v22, %v222_v1  ;;  %v1685_v26 = vld [vmem:[%s1598_s28 + $0x70] sm:$0xff]  ;;  %v1688_v27 = vld [vmem:[%s1598_s28 + $0x68] sm:$0xff]  ;;  %v1691_v28 = vld [vmem:[%s1598_s28 + $0x60] sm:$0xff]  ;;  %v1135_v33 = vadd.s32 4294967168, %v1637_v13 }
  0x39   : > { %v1694_v29 = vsub.s32 %v1685_v26, %v222_v1  ;;  %v1697_v30 = vsub.s32 %v1688_v27, %v222_v1  ;;  %v1700_v31 = vsub.s32 %v1691_v28, %v222_v1  ;;  %v1706_v32 = vld [vmem:[%s1598_s28 + $0x78] sm:$0xff]  ;;  %v1134_v34 = vadd.s32 4294967168, %v1616_v7 }
  0x3a   : > { %v1711_v35 = vsub.s32 %v1706_v32, %v222_v1  ;;  %v1137_v37 = vadd.s32 4294967168, %v1634_v12  ;;  %v1136_v38 = vadd.s32 4294967168, %v1613_v6  ;;  %v1141_v39 = vadd.s32 4294967168, %v1655_v18 }
  0x3b   : > { %v1140_v40 = vadd.s32 4294967168, %v1658_v19  ;;  %v1139_v41 = vadd.s32 4294967168, %v1631_v11  ;;  %v1144_v42 = vadd.s32 4294967168, %v1676_v24  ;;  %v1143_v43 = vadd.s32 4294967168, %v1679_v25 }
  0x3c   : > { %v1142_v44 = vadd.s32 4294967168, %v1652_v17  ;;  %v1147_v45 = vadd.s32 4294967168, %v1697_v30  ;;  %v1146_v46 = vadd.s32 4294967168, %v1700_v31  ;;  %v1145_v47 = vadd.s32 4294967168, %v1673_v23 }
  0x3d   : > { %v1150_v48 = vadd.s32 4294967040, %v1616_v7  ;;  %v1149_v49 = vadd.s32 4294967168, %v1711_v35  ;;  %v1148_v50 = vadd.s32 4294967168, %v1694_v29  ;;  %v1153_v51 = vadd.s32 4294967040, %v1634_v12 }
  0x3e   : > { %v1152_v52 = vadd.s32 4294967040, %v1613_v6  ;;  %v1151_v53 = vadd.s32 4294967040, %v1637_v13  ;;  %v1156_v55 = vadd.s32 4294967040, %v1658_v19  ;;  %v1155_v56 = vadd.s32 4294967040, %v1631_v11 }
  0x3f   : > { %290 = vperm.xlu2 %1298, %v1631_v11   ;;  %284 = vperm.xlu1 %1297, %v1634_v12   ;;  %v1154_v57 = vadd.s32 4294967040, %v1610_v5  ;;  %v1159_v59 = vadd.s32 4294967040, %v1679_v25  ;;  %v1158_v60 = vadd.s32 4294967040, %v1652_v17  ;;  %v1157_v61 = vadd.s32 4294967040, %v1655_v18 }
  0x40   : > { %278 = vperm.xlu0 %1296, %v1637_v13   ;;  %v1162_v63 = vadd.s32 4294967040, %v1700_v31  ;;  %v1161_v1 = vadd.s32 4294967040, %v1673_v23 }
  0x47   : > { %299 = vperm.xlu2 %1298, %v1652_v17   ;;  %296 = vperm.xlu1 %1297, %v1655_v18  }
  0x48   : > { %293 = vperm.xlu0 %1296, %v1658_v19  }
  0x4f   : > { %308 = vperm.xlu2 %1298, %v1673_v23   ;;  %305 = vperm.xlu1 %1297, %v1676_v24  }
  0x50   : > { %302 = vperm.xlu0 %1296, %v1679_v25  }
  0x57   : > { %317 = vperm.xlu2 %1298, %v1694_v29   ;;  %314 = vperm.xlu1 %1297, %v1697_v30  }
  0x58   : > { %311 = vperm.xlu0 %1296, %v1700_v31  }
  0x5f   : > { %445 = vperm.xlu2 %1298, %v1135_v33   ;;  %442 = vperm.xlu1 %1297, %v1134_v34   ;;  %v1160_v33 = vadd.s32 4294967040, %v1676_v24 }
  0x60   : > { %320 = vperm.xlu0 %1296, %v1711_v35  }
  0x67   : > { %454 = vperm.xlu2 %1298, %v1138_v36   ;;  %451 = vperm.xlu1 %1297, %v1137_v37  }
  0x68   : > { %448 = vperm.xlu0 %1296, %v1136_v38   ;;  %v1165_v38 = vadd.s32 4294967040, %v1711_v35 }
  0x6f   : > { %463 = vperm.xlu2 %1298, %v1141_v39   ;;  %460 = vperm.xlu1 %1297, %v1140_v40   ;;  %v1164_v39 = vadd.s32 4294967040, %v1694_v29  ;;  %v1163_v40 = vadd.s32 4294967040, %v1697_v30 }
  0x70   : > { %457 = vperm.xlu0 %1296, %v1139_v41   ;;  %v239_v41 = vlaneseq }
  0x77   : > { %472 = vperm.xlu2 %1298, %v1144_v42   ;;  %469 = vperm.xlu1 %1297, %v1143_v43   ;;  %v1757_v42 = vand.u32 127, %v239_v41 }
  0x78   : > { %466 = vperm.xlu0 %1296, %v1142_v44  }
  0x79   : > { %vm370_vm1 = vcmp.eq.s32.totalorder %v1757_v42, 0 }
  0x7f   : > { %481 = vperm.xlu2 %1298, %v1147_v45   ;;  %478 = vperm.xlu1 %1297, %v1146_v46   ;;  %v243_v45 = vld [vmem:[%s1584_s20 + $0x10] sm:$0xff]  }
  0x80   : > { %475 = vperm.xlu0 %1296, %v1145_v47   ;;  %v1168_v47 = vadd.s32 4294966912, %v1613_v6 }
  0x87   : > { %602 = vperm.xlu2 %1298, %v1150_v48   ;;  %487 = vperm.xlu1 %1297, %v1149_v49   ;;  %v1167_v48 = vadd.s32 4294966912, %v1637_v13  ;;  %v1166_v49 = vadd.s32 4294966912, %v1616_v7 }
  0x88   : > { %484 = vperm.xlu0 %1296, %v1148_v50   ;;  %v259_v50 = vunpack.c.l.bf16 %v243_v45 }
  0x8f   : > { %611 = vperm.xlu2 %1298, %v1153_v51   ;;  %608 = vperm.xlu1 %1297, %v1152_v52   ;;  %v372_v51 = vstv %s371_s5  ;;  %v1457_v52 = vmov 9.784736e-05  }
  0x90   : > { %605 = vperm.xlu0 %1296, %v1151_v53   ;;  %vm373_vm2 = vcmp.eq.s32.totalorder %v372_v51, 1  ;;  %v1172_v51 = vadd.s32 4294966912, %v1658_v19  ;;  %v252_v19 = vld [vmem:[%s1584_s20 + $0xa0] sm:$0xff]  }
  0x91   : > { %v1732_v54 = vpop.permute.xlu2 %287  ;;  %vm1779_vm5 = vmand %vm373_vm2, %vm370_vm1  ;;  %vm874_vm1 = vcmp.ne.s32.totalorder %v1628_v10, 0  ;;  %vm873_vm2 = vcmp.ne.s32.totalorder %v1607_v4, 0  ;;  %v1181_v10 = vadd.s32 4294966912, %v1711_v35  ;;  %v1894_v4 = vld [vmem:[%s1584_s20 + $0x80] sm:$0xff]  }
  0x92   : > { %vm326_vm4 = vcmp.eq.s32.totalorder %v1757_v42, %v1732_v54 }
  0x93   : > { %v342_v54 = vsel %vm326_vm4, 0.9, %v1457_v52 }
  0x97   : > { %620 = vperm.xlu2 %1298, %v1156_v55   ;;  %617 = vperm.xlu1 %1297, %v1155_v56   ;;  %v410_v55 = vunpack.c.h.bf16 %v243_v45 }
  0x98   : > { %614 = vperm.xlu0 %1296, %v1154_v57  }
  0x99   : > { %v1737_v58 = vpop.permute.xlu2 %290 }
  0x9a   : > { %vm327_vm11 = vcmp.eq.s32.totalorder %v1757_v42, %v1737_v58 }
  0x9f   : > { %629 = vperm.xlu2 %1298, %v1159_v59   ;;  %626 = vperm.xlu1 %1297, %v1158_v60   ;;  %v246_v59 = vld [vmem:[%s1584_s20 + $0x40] sm:$0xff]   ;;  %v1171_v60 = vadd.s32 4294966912, %v1631_v11 }
  0xa0   : > { %623 = vperm.xlu0 %1296, %v1157_v61   ;;  %v1170_v61 = vadd.s32 4294966912, %v1610_v5  ;;  %v413_v11 = vunpack.c.h.bf16 %v246_v59 }
  0xa1   : > { %v1742_v62 = vpop.permute.xlu2 %299 }
  0xa7   : > { %638 = vperm.xlu2 %1298, %v1162_v63   ;;  %635 = vperm.xlu1 %1297, %v1161_v1  }
  0xa8   : > { %632 = vperm.xlu0 %1296, %v1160_v33   ;;  %v1169_v33 = vadd.s32 4294966912, %v1634_v12 }
  0xa9   : > { %v1747_v34 = vpop.permute.xlu2 %308  ;;  %v1749_v36 = vpop.permute.xlu1 %281 }
  0xaa   : > { %v1751_v37 = vpop.permute.xlu0 %275  ;;  %vm324_vm12 = vcmp.eq.s32.totalorder %v1757_v42, %v1749_v36 }
  0xab   : > { %vm322_vm8 = vcmp.eq.s32.totalorder %v1757_v42, %v1751_v37 }
  0xaf   : > { %647 = vperm.xlu2 %1298, %v1165_v38   ;;  %644 = vperm.xlu1 %1297, %v1164_v39   ;;  %v262_v38 = vunpack.c.l.bf16 %v246_v59 }
  0xb0   : > { %641 = vperm.xlu0 %1296, %v1163_v40  }
  0xb1   : > { %v1759_v43 = vpop.permute.xlu2 %317  ;;  %v1761_v44 = vpop.permute.xlu1 %284  ;;  %v358_v5 = vmul.f32 %v342_v54, %v262_v38  ;;  %v1815_v38 = vld [vmem:[%s1584_s20 + $0x50] sm:$0xff]   ;;  %v1175_v54 = vadd.s32 4294966912, %v1679_v25 }
  0xb2   : > { %v279_v46 = vpop.permute.xlu0 %278  ;;  %v263_v25 = vunpack.c.l.bf16 %v1815_v38  ;;  %vm325_vm13 = vcmp.eq.s32.totalorder %v1757_v42, %v1761_v44 }
  0xb3   : > { %vm323_vm0 = vcmp.eq.s32.totalorder %v1757_v42, %v279_v46  ;;  %v249_v46 = vld [vmem:[%s1584_s20 + $0x70] sm:$0xff]   ;;  %v341_v58 = vsel %vm325_vm13, 0.9, %v1457_v52 }
  0xb4   : > { %v339_v53 = vsel %vm323_vm0, 0.9, %v1457_v52 }
  0xb5   : > { %v355_v56 = vmul.f32 %v339_v53, %v259_v50  ;;  %v381_v53 = vsel %vm1779_vm5, 0.0, %v358_v5 }
  0xb7   : > { %768 = vperm.xlu2 %1298, %v1168_v47   ;;  %765 = vperm.xlu1 %1297, %v1167_v48   ;;  %v378_v39 = vsel %vm1779_vm5, 0.0, %v355_v56  ;;  %v1174_v48 = vadd.s32 4294966912, %v1652_v17 }
  0xb8   : > { %762 = vperm.xlu0 %1296, %v1166_v49   ;;  %v1173_v49 = vadd.s32 4294966912, %v1655_v18 }
  0xb9   : > { %v297_v57 = vpop.permute.xlu1 %296  ;;  %v446_v6 = vpop.permute.xlu2 %445 }
  0xba   : > { %vm490_vm3 = vcmp.eq.s32.totalorder %v1757_v42, %v446_v6  ;;  %v1772_v13 = vpop.permute.xlu0 %293  ;;  %vm329_vm7 = vcmp.eq.s32.totalorder %v1757_v42, %v297_v57  ;;  %v416_v57 = vunpack.c.h.bf16 %v249_v46 }
  0xbb   : > { %v506_v7 = vsel %vm490_vm3, 0.9, %v1457_v52  ;;  %v345_v56 = vsel %vm329_vm7, 0.9, %v1457_v52  ;;  %vm328_vm3 = vcmp.eq.s32.totalorder %v1757_v42, %v1772_v13 }
  0xbc   : > { %v522_v1 = vmul.f32 %v506_v7, %v410_v55  ;;  %v265_v55 = vunpack.c.l.bf16 %v249_v46  ;;  %v242_v7 = vld [vmem:[%s1584_s20] sm:$0xff]  }
  0xbd   : > { %v258_v5 = vunpack.c.l.bf16 %v242_v7 }
  0xbe   : > { %v1787_v40 = vadd.f32 %v522_v1, %v378_v39  ;;  %v361_v17 = vmul.f32 %v345_v56, %v265_v55  ;;  %v1177_v1 = vadd.s32 4294966912, %v1673_v23  ;;  %v338_v23 = vsel %vm322_vm8, 0.9, %v1457_v52 }
  0xbf   : > { %777 = vperm.xlu2 %1298, %v1171_v60   ;;  %774 = vperm.xlu1 %1297, %v1170_v61   ;;  %v354_v37 = vmul.f32 %v338_v23, %v258_v5  ;;  %v1178_v5 = vadd.s32 4294966912, %v1700_v31  ;;  %vm330_vm8 = vcmp.eq.s32.totalorder %v1757_v42, %v1742_v62 }
  0xc0   : > { %771 = vperm.xlu0 %1296, %v1169_v33   ;;  %v1176_v33 = vadd.s32 4294966912, %v1676_v24  ;;  %v384_v46 = vsel %vm1779_vm5, 0.0, %v361_v17 }
  0xc1   : > { %v306_v41 = vpop.permute.xlu1 %305  ;;  %v455_v45 = vpop.permute.xlu2 %454 }
  0xc2   : > { %vm493_vm6 = vcmp.eq.s32.totalorder %v1757_v42, %v455_v45  ;;  %v1791_v47 = vpop.permute.xlu0 %302  ;;  %vm332_vm10 = vcmp.eq.s32.totalorder %v1757_v42, %v306_v41  ;;  %v1822_v45 = vld [vmem:[%s1584_s20 + $0x30] sm:$0xff]   ;;  %v268_v41 = vunpack.c.l.bf16 %v252_v19 }
  0xc3   : > { %v509_v12 = vsel %vm493_vm6, 0.9, %v1457_v52  ;;  %v348_v24 = vsel %vm332_vm10, 0.9, %v1457_v52  ;;  %vm876_vm10 = vcmp.ne.s32.totalorder %v1625_v9, 0 }
  0xc4   : > { %v525_v50 = vmul.f32 %v509_v12, %v413_v11  ;;  %v1819_v11 = vld [vmem:[%s1584_s20 + $0x20] sm:$0xff]  }
  0xc6   : > { %v1801_v6 = vadd.f32 %v525_v50, %v381_v53  ;;  %v419_v50 = vunpack.c.h.bf16 %v252_v19  ;;  %v364_v53 = vmul.f32 %v348_v24, %v268_v41 }
  0xc7   : > { %786 = vperm.xlu2 %1298, %v1174_v48   ;;  %783 = vperm.xlu1 %1297, %v1173_v49   ;;  %v260_v48 = vunpack.c.l.bf16 %v1819_v11  ;;  %v261_v49 = vunpack.c.l.bf16 %v1822_v45 }
  0xc8   : > { %780 = vperm.xlu0 %1296, %v1172_v51   ;;  %v409_v51 = vunpack.c.h.bf16 %v242_v7 }
  0xc9   : > { %v315_v18 = vpop.permute.xlu1 %314  ;;  %v464_v59 = vpop.permute.xlu2 %463  ;;  %v357_v44 = vmul.f32 %v341_v58, %v261_v49 }
  0xca   : > { %vm496_vm9 = vcmp.eq.s32.totalorder %v1757_v42, %v464_v59  ;;  %v1808_v60 = vpop.permute.xlu0 %311  ;;  %v1180_v59 = vadd.s32 4294966912, %v1694_v29  ;;  %vm335_vm0 = vcmp.eq.s32.totalorder %v1757_v42, %v315_v18  ;;  %v340_v29 = vsel %vm324_vm12, 0.9, %v1457_v52 }
  0xcb   : > { %v512_v61 = vsel %vm496_vm9, 0.9, %v1457_v52  ;;  %v377_v18 = vsel %vm1779_vm5, 0.0, %v354_v37  ;;  %v351_v41 = vsel %vm335_vm0, 0.9, %v1457_v52  ;;  %v412_v37 = vunpack.c.h.bf16 %v1822_v45 }
  0xcc   : > { %v528_v39 = vmul.f32 %v512_v61, %v416_v57  ;;  %v255_v57 = vld [vmem:[%s1584_s20 + $0xd0] sm:$0xff]   ;;  %v1179_v61 = vadd.s32 4294966912, %v1697_v30  ;;  %v387_v30 = vsel %vm1779_vm5, 0.0, %v364_v53  ;;  %v380_v35 = vsel %vm1779_vm5, 0.0, %v357_v44 }
  0xcd   : > { %vm877_vm9 = vcmp.ne.s32.totalorder %v1601_v2, 0  ;;  %vm333_vm0 = vcmp.eq.s32.totalorder %v1757_v42, %v1747_v34 }
  0xce   : > { %v1831_v12 = vadd.f32 %v528_v39, %v384_v46  ;;  %v271_v46 = vunpack.c.l.bf16 %v255_v57  ;;  %v893_v9 = vsel %vm877_vm9, 1, %v1456_v0  ;;  %vm883_vm9 = vcmp.ne.s32.totalorder %v1667_v21, 0 }
  0xcf   : > { %795 = vperm.xlu2 %1298, %v1177_v1   ;;  %792 = vperm.xlu1 %1297, %v1176_v33   ;;  %v343_v1 = vsel %vm327_vm11, 0.9, %v1457_v52  ;;  %v1857_v33 = vld [vmem:[%s1584_s20 + $0x60] sm:$0xff]   ;;  %vm331_vm11 = vcmp.eq.s32.totalorder %v1757_v42, %v1791_v47  ;;  %v349_v47 = vsel %vm333_vm0, 0.9, %v1457_v52 }
  0xd0   : > { %789 = vperm.xlu0 %1296, %v1175_v54   ;;  %v1877_v36 = vmul.f32 %v343_v1, %v263_v25  ;;  %v264_v24 = vunpack.c.l.bf16 %v1857_v33  ;;  %v367_v53 = vmul.f32 %v351_v41, %v271_v46  ;;  %v415_v13 = vunpack.c.h.bf16 %v1857_v33 }
  0xd1   : > { %v473_v55 = vpop.permute.xlu2 %472  ;;  %v443_v56 = vpop.permute.xlu1 %442  ;;  %v347_v2 = vsel %vm331_vm11, 0.9, %v1457_v52  ;;  %vm882_vm11 = vcmp.ne.s32.totalorder %v1670_v22, 0  ;;  %v899_v22 = vsel %vm883_vm9, 1, %v1456_v0 }
  0xd2   : > { %vm499_vm14 = vcmp.eq.s32.totalorder %v1757_v42, %v473_v55  ;;  %v1844_v17 = vpop.permute.xlu0 %320  ;;  %vm489_vm15 = vcmp.eq.s32.totalorder %v1757_v42, %v443_v56  ;;  %v411_v56 = vunpack.c.h.bf16 %v1819_v11  ;;  %v382_v58 = vsel %vm1779_vm5, 0.0, %v1877_v36  ;;  %v251_v36 = vld [vmem:[%s1584_s20 + $0x90] sm:$0xff]  }
  0xd3   : > { %v515_v7 = vsel %vm499_vm14, 0.9, %v1457_v52  ;;  %v505_v19 = vsel %vm489_vm15, 0.9, %v1457_v52  ;;  %vm875_vm14 = vcmp.ne.s32.totalorder %v1604_v3, 0 }
  0xd4   : > { %v531_v39 = vmul.f32 %v515_v7, %v419_v50  ;;  %v521_v54 = vmul.f32 %v505_v19, %v409_v51  ;;  %v356_v50 = vmul.f32 %v340_v29, %v260_v48  ;;  %v422_v51 = vunpack.c.h.bf16 %v255_v57 }
  0xd5   : > { %v890_v48 = vsel %vm874_vm1, 1, %v1456_v0  ;;  %v889_v19 = vsel %vm873_vm2, 1, %v1456_v0  ;;  %vm880_vm1 = vcmp.ne.s32.totalorder %v1646_v15, 0  ;;  %vm879_vm2 = vcmp.ne.s32.totalorder %v1649_v16, 0 }
  0xd6   : > { %v1873_v31 = vadd.f32 %v531_v39, %v387_v30  ;;  %v1875_v23 = vadd.f32 %v521_v54, %v377_v18  ;;  %v1905_v39 = vld [vmem:[%s1584_s20 + $0x8] sm:$0xff]   ;;  %v379_v54 = vsel %vm1779_vm5, 0.0, %v356_v50  ;;  %v266_v30 = vunpack.c.l.bf16 %v1894_v4 }
  0xd7   : > { %804 = vperm.xlu2 %1298, %v1180_v59   ;;  %801 = vperm.xlu1 %1297, %v1179_v61   ;;  %v390_v61 = vsel %vm1779_vm5, 0.0, %v367_v53  ;;  %v569_v41 = vunpack.c.l.bf16 %v1905_v39  ;;  %v346_v50 = vsel %vm330_vm8, 0.9, %v1457_v52  ;;  %v896_v16 = vsel %vm880_vm1, 1, %v1456_v0 }
  0xd8   : > { %798 = vperm.xlu0 %1296, %v1178_v5   ;;  %v344_v5 = vsel %vm328_vm3, 0.9, %v1457_v52  ;;  %vm334_vm3 = vcmp.eq.s32.totalorder %v1757_v42, %v1808_v60  ;;  %vm886_vm1 = vcmp.ne.s32.totalorder %v1688_v27, 0 }
  0xd9   : > { %v482_v55 = vpop.permute.xlu2 %481  ;;  %v452_v7 = vpop.permute.xlu1 %451 }
  0xda   : > { %vm502_vm4 = vcmp.eq.s32.totalorder %v1757_v42, %v482_v55  ;;  %v449_v25 = vpop.permute.xlu0 %448  ;;  %vm492_vm6 = vcmp.eq.s32.totalorder %v1757_v42, %v452_v7 }
  0xdb   : > { %v518_v45 = vsel %vm502_vm4, 0.9, %v1457_v52  ;;  %vm491_vm7 = vcmp.eq.s32.totalorder %v1757_v42, %v449_v25  ;;  %v508_v11 = vsel %vm492_vm6, 0.9, %v1457_v52  ;;  %v892_v25 = vsel %vm876_vm10, 1, %v1456_v0 }
  0xdc   : > { %v534_v49 = vmul.f32 %v518_v45, %v422_v51  ;;  %v507_v57 = vsel %vm491_vm7, 0.9, %v1457_v52  ;;  %v524_v59 = vmul.f32 %v508_v11, %v412_v37  ;;  %v360_v51 = vmul.f32 %v344_v5, %v264_v24  ;;  %v1945_v24 = vld [vmem:[%s1584_s20 + $0xb0] sm:$0xff]  }
  0xdd   : > { %v523_v1 = vmul.f32 %v507_v57, %v411_v56  ;;  %v414_v37 = vunpack.c.h.bf16 %v1815_v38  ;;  %v891_v11 = vsel %vm875_vm14, 1, %v1456_v0  ;;  %vm878_vm7 = vcmp.ne.s32.totalorder %v1622_v8, 0 }
  0xde   : > { %v1913_v29 = vadd.f32 %v534_v49, %v390_v61  ;;  %v1915_v18 = vadd.f32 %v524_v59, %v380_v35  ;;  %v383_v3 = vsel %vm1779_vm5, 0.0, %v360_v51  ;;  %v269_v59 = vunpack.c.l.bf16 %v1945_v24 }
  0xdf   : > { %v1918_v46 = vadd.f32 %v523_v1, %v379_v54  ;;  %909 = vperm.xlu2 %1298, %v890_v48   ;;  %906 = vperm.xlu1 %1297, %v889_v19   ;;  %v1953_v48 = vld [vmem:[%s1584_s20 + $0x38] sm:$0xff]   ;;  %v362_v35 = vmul.f32 %v346_v50, %v266_v30  ;;  %v418_v61 = vunpack.c.h.bf16 %v251_v36  ;;  %v417_v1 = vunpack.c.h.bf16 %v1894_v4 }
  0xe0   : > { %807 = vperm.xlu0 %1296, %v1181_v10   ;;  %v267_v10 = vunpack.c.l.bf16 %v251_v36  ;;  %v572_v34 = vunpack.c.l.bf16 %v1953_v48  ;;  %vm336_vm10 = vcmp.eq.s32.totalorder %v1757_v42, %v1759_v43 }
  0xe1   : > { %v603_v44 = vpop.permute.xlu2 %602  ;;  %v461_v53 = vpop.permute.xlu1 %460  ;;  %v385_v15 = vsel %vm1779_vm5, 0.0, %v362_v35 }
  0xe2   : > { %v458_v33 = vpop.permute.xlu0 %457  ;;  %vm649_vm12 = vcmp.eq.s32.totalorder %v1757_v42, %v603_v44  ;;  %vm495_vm13 = vcmp.eq.s32.totalorder %v1757_v42, %v461_v53  ;;  %v895_v44 = vsel %vm879_vm2, 1, %v1456_v0  ;;  %vm885_vm2 = vcmp.ne.s32.totalorder %v1691_v28, 0 }
  0xe3   : > { %vm494_vm15 = vcmp.eq.s32.totalorder %v1757_v42, %v458_v33  ;;  %v665_v62 = vsel %vm649_vm12, 0.9, %v1457_v52  ;;  %v511_v38 = vsel %vm495_vm13, 0.9, %v1457_v52  ;;  %v894_v33 = vsel %vm878_vm7, 1, %v1456_v0 }
  0xe4   : > { %v510_v55 = vsel %vm494_vm15, 0.9, %v1457_v52  ;;  %v681_v56 = vmul.f32 %v665_v62, %v569_v41  ;;  %v527_v7 = vmul.f32 %v511_v38, %v415_v13  ;;  %v1987_v13 = vld [vmem:[%s1584_s20 + $0xe0] sm:$0xff]   ;;  %v1995_v62 = vld [vmem:[%s1584_s20 + $0x68] sm:$0xff]   ;;  %v350_v38 = vsel %vm334_vm3, 0.9, %v1457_v52 }
  0xe5   : > { %v526_v45 = vmul.f32 %v510_v55, %v414_v37  ;;  %vm337_vm12 = vcmp.eq.s32.totalorder %v1757_v42, %v1844_v17  ;;  %vm881_vm15 = vcmp.ne.s32.totalorder %v1643_v14, 0 }
  0xe6   : > { %v1962_v49 = vadd.f32 %v681_v56, %v1875_v23  ;;  %v1964_v57 = vadd.f32 %v527_v7, %v383_v3  ;;  %v363_v23 = vmul.f32 %v347_v2, %v267_v10  ;;  %v272_v56 = vunpack.c.l.bf16 %v1987_v13  ;;  %v257_v2 = vld [vmem:[%s1584_s20 + $0xf0] sm:$0xff]  }
  0xe7   : > { %v1967_v19 = vadd.f32 %v526_v45, %v382_v58  ;;  %918 = vperm.xlu2 %1298, %v893_v9   ;;  %915 = vperm.xlu1 %1297, %v892_v25   ;;  %v254_v58 = vld [vmem:[%s1584_s20 + $0xc0] sm:$0xff]   ;;  %v365_v25 = vmul.f32 %v349_v47, %v269_v59  ;;  %v575_v3 = vunpack.c.l.bf16 %v1995_v62  ;;  %v273_v14 = vunpack.c.l.bf16 %v257_v2 }
  0xe8   : > { %912 = vperm.xlu0 %1296, %v891_v11   ;;  %v386_v8 = vsel %vm1779_vm5, 0.0, %v363_v23  ;;  %v270_v53 = vunpack.c.l.bf16 %v254_v58  ;;  %v421_v10 = vunpack.c.h.bf16 %v254_v58  ;;  %v898_v23 = vsel %vm882_vm11, 1, %v1456_v0  ;;  %v2035_v58 = vld [vmem:[%s1584_s20 + $0x98] sm:$0xff]  }
  0xe9   : > { %v612_v54 = vpop.permute.xlu2 %611  ;;  %v470_v5 = vpop.permute.xlu1 %469  ;;  %v353_v21 = vsel %vm337_vm12, 0.9, %v1457_v52 }
  0xea   : > { %v467_v30 = vpop.permute.xlu0 %466  ;;  %vm652_vm4 = vcmp.eq.s32.totalorder %v1757_v42, %v612_v54  ;;  %vm498_vm6 = vcmp.eq.s32.totalorder %v1757_v42, %v470_v5  ;;  %v366_v60 = vmul.f32 %v350_v38, %v270_v53  ;;  %v897_v5 = vsel %vm881_vm15, 1, %v1456_v0 }
  0xeb   : > { %vm497_vm8 = vcmp.eq.s32.totalorder %v1757_v42, %v467_v30  ;;  %v668_v4 = vsel %vm652_vm4, 0.9, %v1457_v52  ;;  %v514_v41 = vsel %vm498_vm6, 0.9, %v1457_v52  ;;  %v388_v30 = vsel %vm1779_vm5, 0.0, %v365_v25 }
  0xec   : > { %v513_v50 = vsel %vm497_vm8, 0.9, %v1457_v52  ;;  %v684_v51 = vmul.f32 %v668_v4, %v572_v34  ;;  %v530_v37 = vmul.f32 %v514_v41, %v418_v61  ;;  %v369_v17 = vmul.f32 %v353_v21, %v273_v14 }
  0xed   : > { %v529_v36 = vmul.f32 %v513_v50, %v417_v1  ;;  %v389_v1 = vsel %vm1779_vm5, 0.0, %v366_v60  ;;  %vm884_vm6 = vcmp.ne.s32.totalorder %v1664_v20, 0  ;;  %v901_v38 = vsel %vm885_vm2, 1, %v1456_v0 }
  0xee   : > { %v2004_v9 = vadd.f32 %v684_v51, %v1915_v18  ;;  %v2006_v55 = vadd.f32 %v530_v37, %v386_v8  ;;  %v420_v18 = vunpack.c.h.bf16 %v1945_v24  ;;  %v578_v51 = vunpack.c.l.bf16 %v2035_v58 }
  0xef   : > { %v2009_v7 = vadd.f32 %v529_v36, %v385_v15  ;;  %927 = vperm.xlu2 %1298, %v896_v16   ;;  %924 = vperm.xlu1 %1297, %v895_v44   ;;  %v352_v16 = vsel %vm336_vm10, 0.9, %v1457_v52  ;;  %v424_v37 = vunpack.c.h.bf16 %v257_v2  ;;  %v902_v36 = vsel %vm886_vm1, 1, %v1456_v0 }
  0xf0   : > { %921 = vperm.xlu0 %1296, %v894_v33   ;;  %v368_v53 = vmul.f32 %v352_v16, %v272_v56  ;;  %v392_v56 = vsel %vm1779_vm5, 0.0, %v369_v17  ;;  %v900_v20 = vsel %vm884_vm6, 1, %v1456_v0  ;;  %vm887_vm10 = vcmp.ne.s32.totalorder %v1685_v26, 0  ;;  %v2108_v26 = vld [vmem:[%s1584_s20 + $0x58] sm:$0xff]   ;;  %v2115_v16 = vld [vmem:[%s1584_s20 + $0x48] sm:$0xff]  }
  0xf1   : > { %v621_v45 = vpop.permute.xlu2 %620  ;;  %v479_v11 = vpop.permute.xlu1 %478  ;;  %v573_v17 = vunpack.c.l.bf16 %v2115_v16 }
  0xf2   : > { %v476_v59 = vpop.permute.xlu0 %475  ;;  %vm655_vm13 = vcmp.eq.s32.totalorder %v1757_v42, %v621_v45  ;;  %vm501_vm14 = vcmp.eq.s32.totalorder %v1757_v42, %v479_v11  ;;  %v391_v60 = vsel %vm1779_vm5, 0.0, %v368_v53  ;;  %v2082_v11 = vld [vmem:[%s1584_s20 + $0x18] sm:$0xff]   ;;  %vm888_vm5 = vcmp.ne.s32.totalorder %v1706_v32, 0 }
  0xf3   : > { %vm500_vm0 = vcmp.eq.s32.totalorder %v1757_v42, %v476_v59  ;;  %v671_v24 = vsel %vm655_vm13, 0.9, %v1457_v52  ;;  %v517_v35 = vsel %vm501_vm14, 0.9, %v1457_v52 }
  0xf4   : > { %v516_v34 = vsel %vm500_vm0, 0.9, %v1457_v52  ;;  %v687_v61 = vmul.f32 %v671_v24, %v575_v3  ;;  %v533_v47 = vmul.f32 %v517_v35, %v421_v10  ;;  %v2071_v3 = vld [vmem:[%s1584_s20 + $0xc8] sm:$0xff]   ;;  %v570_v35 = vunpack.c.l.bf16 %v2082_v11 }
  0xf5   : > { %v532_v54 = vmul.f32 %v516_v34, %v420_v18  ;;  %v2074_v10 = vld [vmem:[%s1584_s20 + $0x28] sm:$0xff]   ;;  %v581_v59 = vunpack.c.l.bf16 %v2071_v3 }
  0xf6   : > { %v2044_v4 = vadd.f32 %v687_v61, %v1964_v57  ;;  %v2046_v41 = vadd.f32 %v533_v47, %v389_v1  ;;  %v423_v57 = vunpack.c.h.bf16 %v1987_v13  ;;  %v571_v24 = vunpack.c.l.bf16 %v2074_v10 }
  0xf7   : > { %v2052_v50 = vadd.f32 %v532_v54, %v388_v30  ;;  %936 = vperm.xlu2 %1298, %v899_v22   ;;  %933 = vperm.xlu1 %1297, %v898_v23   ;;  %v904_v1 = vsel %vm888_vm5, 1, %v1456_v0  ;;  %v903_v54 = vsel %vm887_vm10, 1, %v1456_v0  ;;  %v574_v0 = vunpack.c.l.bf16 %v2108_v26 }
  0xf8   : > { %930 = vperm.xlu0 %1296, %v897_v5   ;;  %v2105_v5 = vld [vmem:[%s1584_s20 + $0xf8] sm:$0xff]  }
  0xf9   : > { %v630_v44 = vpop.permute.xlu2 %629  ;;  %v488_v8 = vpop.permute.xlu1 %487 }
  0xfa   : > { %v485_v43 = vpop.permute.xlu0 %484  ;;  %vm658_vm3 = vcmp.eq.s32.totalorder %v1757_v42, %v630_v44  ;;  %vm504_vm4 = vcmp.eq.s32.totalorder %v1757_v42, %v488_v8 }
  0xfb   : > { %vm503_vm7 = vcmp.eq.s32.totalorder %v1757_v42, %v485_v43  ;;  %v674_v27 = vsel %vm658_vm3, 0.9, %v1457_v52  ;;  %v520_v13 = vsel %vm504_vm4, 0.9, %v1457_v52 }
  0xfc   : > { %v519_v28 = vsel %vm503_vm7, 0.9, %v1457_v52  ;;  %v690_v33 = vmul.f32 %v674_v27, %v578_v51  ;;  %v536_v15 = vmul.f32 %v520_v13, %v424_v37  ;;  %v584_v37 = vunpack.c.l.bf16 %v2105_v5  ;;  %v2130_v13 = vld [vmem:[%s1584_s20 + $0x88] sm:$0xff]  }
  0xfd   : > { %v535_v25 = vmul.f32 %v519_v28, %v423_v57 }
  0xfe   : > { %v2079_v18 = vadd.f32 %v690_v33, %v2006_v55  ;;  %v552_v45 = vadd.f32 %v536_v15, %v392_v56  ;;  %v2138_v33 = vld [vmem:[%s1584_s20 + $0x78] sm:$0xff]   ;;  %v577_v56 = vunpack.c.l.bf16 %v2130_v13 }
  0xff   : > { %v2084_v2 = vadd.f32 %v535_v25, %v391_v60  ;;  %945 = vperm.xlu2 %1298, %v902_v36   ;;  %942 = vperm.xlu1 %1297, %v901_v38   ;;  %v731_v38 = vunpack.c.h.bf16 %v2074_v10  ;;  %v576_v25 = vunpack.c.l.bf16 %v2138_v33 }
 0x100   : > { %939 = vperm.xlu0 %1296, %v900_v20  }
 0x101   : > { %v639_v63 = vpop.permute.xlu2 %638  ;;  %v609_v22 = vpop.permute.xlu1 %608 }
 0x102   : > { %v606_v55 = vpop.permute.xlu0 %605  ;;  %vm661_vm8 = vcmp.eq.s32.totalorder %v1757_v42, %v639_v63  ;;  %vm651_vm9 = vcmp.eq.s32.totalorder %v1757_v42, %v609_v22  ;;  %v2153_v63 = vld [vmem:[%s1584_s20 + $0xb8] sm:$0xff]  }
 0x103   : > { %vm650_vm11 = vcmp.eq.s32.totalorder %v1757_v42, %v606_v55  ;;  %v677_v34 = vsel %vm661_vm8, 0.9, %v1457_v52  ;;  %v667_v32 = vsel %vm651_vm9, 0.9, %v1457_v52  ;;  %v2159_v55 = vld [vmem:[%s1584_s20 + $0xa8] sm:$0xff]  }
 0x104   : > { %v666_v61 = vsel %vm650_vm11, 0.9, %v1457_v52  ;;  %v693_v47 = vmul.f32 %v677_v34, %v581_v59  ;;  %v683_v23 = vmul.f32 %v667_v32, %v571_v24 }
 0x105   : > { %v682_v14 = vmul.f32 %v666_v61, %v570_v35  ;;  %v580_v61 = vunpack.c.l.bf16 %v2153_v63 }
 0x106   : > { %v2111_v30 = vadd.f32 %v693_v47, %v2046_v41  ;;  %v699_v21 = vadd.f32 %v683_v23, %v1918_v46  ;;  %v579_v47 = vunpack.c.l.bf16 %v2159_v55 }
 0x107   : > { %v2118_v51 = vadd.f32 %v682_v14, %v1787_v40  ;;  %951 = vperm.xlu1 %1297, %v904_v1  }
 0x108   : > { %948 = vperm.xlu0 %1296, %v903_v54  }
 0x109   : > { %v648_v57 = vpop.permute.xlu2 %647  ;;  %v618_v41 = vpop.permute.xlu1 %617 }
 0x10a   : > { %v615_v44 = vpop.permute.xlu0 %614  ;;  %vm664_vm12 = vcmp.eq.s32.totalorder %v1757_v42, %v648_v57  ;;  %vm654_vm13 = vcmp.eq.s32.totalorder %v1757_v42, %v618_v41 }
 0x10b   : > { %vm653_vm14 = vcmp.eq.s32.totalorder %v1757_v42, %v615_v44  ;;  %v680_v40 = vsel %vm664_vm12, 0.9, %v1457_v52  ;;  %v670_v46 = vsel %vm654_vm13, 0.9, %v1457_v52 }
 0x10c   : > { %v669_v8 = vsel %vm653_vm14, 0.9, %v1457_v52  ;;  %v696_v53 = vmul.f32 %v680_v40, %v584_v37  ;;  %v686_v43 = vmul.f32 %v670_v46, %v574_v0 }
 0x10d   : > { %v685_v27 = vmul.f32 %v669_v8, %v573_v17  ;;  %v2181_v17 = vld [vmem:[%s1584_s20 + $0xd8] sm:$0xff]  }
 0x10e   : > { %v2132_v36 = vadd.f32 %v696_v53, %v552_v45  ;;  %v2135_v28 = vadd.f32 %v686_v43, %v1967_v19  ;;  %v582_v44 = vunpack.c.l.bf16 %v2181_v17 }
 0x10f   : > { %v2141_v15 = vadd.f32 %v685_v27, %v1801_v6 }
 0x111   : > { %v769_v20 = vpop.permute.xlu2 %768  ;;  %v627_v60 = vpop.permute.xlu1 %626 }
 0x112   : > { %v624_v45 = vpop.permute.xlu0 %623  ;;  %vm811_vm15 = vcmp.eq.s32.totalorder %v1757_v42, %v769_v20  ;;  %vm657_vm0 = vcmp.eq.s32.totalorder %v1757_v42, %v627_v60 }
 0x113   : > { %vm656_vm1 = vcmp.eq.s32.totalorder %v1757_v42, %v624_v45  ;;  %v827_v6 = vsel %vm811_vm15, 0.9, %v1457_v52  ;;  %v673_v19 = vsel %vm657_vm0, 0.9, %v1457_v52 }
 0x114   : > { %v672_v10 = vsel %vm656_vm1, 0.9, %v1457_v52  ;;  %v843_v59 = vmul.f32 %v827_v6, %v731_v38  ;;  %v689_v24 = vmul.f32 %v673_v19, %v577_v56  ;;  %v730_v56 = vunpack.c.h.bf16 %v2082_v11 }
 0x115   : > { %v688_v35 = vmul.f32 %v672_v10, %v576_v25  ;;  %v729_v25 = vunpack.c.h.bf16 %v1905_v39  ;;  %v733_v11 = vunpack.c.h.bf16 %v2115_v16  ;;  %v732_v39 = vunpack.c.h.bf16 %v1953_v48 }
 0x116   : > { %v2156_v22 = vadd.f32 %v689_v24, %v2009_v7  ;;  %v2161_v34 = vadd.f32 %v843_v59, %v699_v21 }
 0x117   : > { %v2164_v32 = vadd.f32 %v688_v35, %v1831_v12  ;;  %v2175_v12 = vld [vmem:[%s1584_s20 + $0xe8] sm:$0xff]  }
 0x118   : > { %v583_v41 = vunpack.c.l.bf16 %v2175_v12 }
 0x119   : > { %v636_v23 = vpop.permute.xlu1 %635  ;;  %v2172_v37 = vpop.permute.xlu2 %777 }
 0x11a   : > { %v633_v1 = vpop.permute.xlu0 %632  ;;  %vm660_vm2 = vcmp.eq.s32.totalorder %v1757_v42, %v636_v23  ;;  %vm814_vm14 = vcmp.eq.s32.totalorder %v1757_v42, %v2172_v37 }
 0x11b   : > { %vm659_vm3 = vcmp.eq.s32.totalorder %v1757_v42, %v633_v1  ;;  %v676_v7 = vsel %vm660_vm2, 0.9, %v1457_v52 }
 0x11c   : > { %v675_v14 = vsel %vm659_vm3, 0.9, %v1457_v52  ;;  %v692_v54 = vmul.f32 %v676_v7, %v580_v61 }
 0x11d   : > { %v691_v21 = vmul.f32 %v675_v14, %v579_v47 }
 0x11e   : > { %v2178_v0 = vadd.f32 %v692_v54, %v2052_v50 }
 0x11f   : > { %v2184_v57 = vadd.f32 %v691_v21, %v1873_v31 }
 0x121   : > { %v645_v40 = vpop.permute.xlu1 %644  ;;  %v2198_v38 = vpop.permute.xlu2 %786 }
 0x122   : > { %v642_v46 = vpop.permute.xlu0 %641  ;;  %vm663_vm4 = vcmp.eq.s32.totalorder %v1757_v42, %v645_v40  ;;  %vm817_vm2 = vcmp.eq.s32.totalorder %v1757_v42, %v2198_v38 }
 0x123   : > { %vm662_vm6 = vcmp.eq.s32.totalorder %v1757_v42, %v642_v46  ;;  %v679_v8 = vsel %vm663_vm4, 0.9, %v1457_v52 }
 0x124   : > { %v678_v50 = vsel %vm662_vm6, 0.9, %v1457_v52  ;;  %v695_v53 = vmul.f32 %v679_v8, %v583_v41 }
 0x125   : > { %v694_v43 = vmul.f32 %v678_v50, %v582_v44 }
 0x126   : > { %v2193_v27 = vadd.f32 %v695_v53, %v2084_v2  ;;  %v735_v53 = vunpack.c.h.bf16 %v1995_v62 }
 0x127   : > { %v2196_v31 = vadd.f32 %v694_v43, %v1913_v29  ;;  %v736_v43 = vunpack.c.h.bf16 %v2138_v33 }
 0x129   : > { %v766_v20 = vpop.permute.xlu1 %765  ;;  %v2209_v59 = vpop.permute.xlu2 %795 }
 0x12a   : > { %v763_v60 = vpop.permute.xlu0 %762  ;;  %vm810_vm7 = vcmp.eq.s32.totalorder %v1757_v42, %v766_v20  ;;  %v734_v20 = vunpack.c.h.bf16 %v2108_v26  ;;  %v738_v26 = vunpack.c.h.bf16 %v2035_v58 }
 0x12b   : > { %vm809_vm5 = vcmp.eq.s32.totalorder %v1757_v42, %v763_v60  ;;  %v826_v45 = vsel %vm810_vm7, 0.9, %v1457_v52 }
 0x12c   : > { %v825_v2 = vsel %vm809_vm5, 0.9, %v1457_v52  ;;  %v842_v6 = vmul.f32 %v826_v45, %v730_v56 }
 0x12d   : > { %v841_v19 = vmul.f32 %v825_v2, %v729_v25 }
 0x12e   : > { %v858_v29 = vadd.f32 %v842_v6, %v2118_v51  ;;  %v830_v6 = vsel %vm814_vm14, 0.9, %v1457_v52 }
 0x12f   : > { %v857_v10 = vadd.f32 %v841_v19, %v1962_v49  ;;  %v846_v33 = vmul.f32 %v830_v6, %v734_v20 }
 0x131   : > { %v775_v24 = vpop.permute.xlu1 %774  ;;  %v2218_v14 = vpop.permute.xlu2 %804 }
 0x132   : > { %v772_v35 = vpop.permute.xlu0 %771  ;;  %vm813_vm8 = vcmp.eq.s32.totalorder %v1757_v42, %v775_v24  ;;  %vm823_vm14 = vcmp.eq.s32.totalorder %v1757_v42, %v2218_v14 }
 0x133   : > { %vm812_vm9 = vcmp.eq.s32.totalorder %v1757_v42, %v772_v35  ;;  %v829_v61 = vsel %vm813_vm8, 0.9, %v1457_v52 }
 0x134   : > { %v828_v47 = vsel %vm812_vm9, 0.9, %v1457_v52  ;;  %v845_v23 = vmul.f32 %v829_v61, %v733_v11  ;;  %vm820_vm9 = vcmp.eq.s32.totalorder %v1757_v42, %v2209_v59 }
 0x135   : > { %v844_v51 = vmul.f32 %v828_v47, %v732_v39 }
 0x136   : > { %v861_v49 = vadd.f32 %v845_v23, %v2141_v15  ;;  %v862_v23 = vadd.f32 %v846_v33, %v2135_v28  ;;  %v740_v28 = vunpack.c.h.bf16 %v2153_v63 }
 0x137   : > { %v860_v16 = vadd.f32 %v844_v51, %v2004_v9  ;;  %v833_v51 = vsel %vm817_vm2, 0.9, %v1457_v52 }
 0x139   : > { %v784_v1 = vpop.permute.xlu1 %783  ;;  %v910_v21 = vpop.permute.xlu2 %909 }
 0x13a   : > { %v781_v7 = vpop.permute.xlu0 %780  ;;  %vm954_vm10 = vcmp.eq.s32.totalorder %v910_v21, 1  ;;  %vm816_vm13 = vcmp.eq.s32.totalorder %v1757_v42, %v784_v1 }
 0x13b   : > { %v970_v15 = vsel %vm954_vm10, %v858_v29, 0.0  ;;  %vm815_vm12 = vcmp.eq.s32.totalorder %v1757_v42, %v781_v7  ;;  %v832_v45 = vsel %vm816_vm13, 0.9, %v1457_v52 }
 0x13c   : > { %v831_v60 = vsel %vm815_vm12, 0.9, %v1457_v52  ;;  %v848_v62 = vmul.f32 %v832_v45, %v736_v43 }
 0x13d   : > { %v847_v29 = vmul.f32 %v831_v60, %v735_v53  ;;  %v743_v60 = vunpack.c.h.bf16 %v2175_v12  ;;  %v839_v12 = vsel %vm823_vm14, 0.9, %v1457_v52 }
 0x13e   : > { %v864_v39 = vadd.f32 %v848_v62, %v2164_v32 }
 0x13f   : > { %v863_v24 = vadd.f32 %v847_v29, %v2044_v4  ;;  %v855_v33 = vmul.f32 %v839_v12, %v743_v60 }
 0x141   : > { %v2220_v48 = vpop.permute.xlu1 %792  ;;  %v919_v40 = vpop.permute.xlu2 %918 }
 0x142   : > { %v790_v54 = vpop.permute.xlu0 %789  ;;  %vm957_vm4 = vcmp.eq.s32.totalorder %v919_v40, 1  ;;  %v739_v40 = vunpack.c.h.bf16 %v2159_v55  ;;  %vm819_vm10 = vcmp.eq.s32.totalorder %v1757_v42, %v2220_v48  ;;  %v836_v55 = vsel %vm820_vm9, 0.9, %v1457_v52 }
 0x143   : > { %vm818_vm1 = vcmp.eq.s32.totalorder %v1757_v42, %v790_v54  ;;  %v973_v1 = vsel %vm957_vm4, %v861_v49, 0.0  ;;  %v741_v49 = vunpack.c.h.bf16 %v2071_v3  ;;  %v835_v48 = vsel %vm819_vm10, 0.9, %v1457_v52 }
 0x144   : > { %v834_v61 = vsel %vm818_vm1, 0.9, %v1457_v52  ;;  %v851_v20 = vmul.f32 %v835_v48, %v739_v40 }
 0x145   : > { %v850_v54 = vmul.f32 %v834_v61, %v738_v26 }
 0x149   : > { %v2222_v41 = vpop.permute.xlu1 %801  ;;  %v928_v56 = vpop.permute.xlu2 %927 }
 0x14a   : > { %v2224_v44 = vpop.permute.xlu0 %798  ;;  %vm960_vm3 = vcmp.eq.s32.totalorder %v928_v56, 1  ;;  %vm822_vm8 = vcmp.eq.s32.totalorder %v1757_v42, %v2222_v41 }
 0x14b   : > { %v976_v38 = vsel %vm960_vm3, %v864_v39, 0.0  ;;  %vm821_vm5 = vcmp.eq.s32.totalorder %v1757_v42, %v2224_v44  ;;  %v866_v44 = vadd.f32 %v850_v54, %v2079_v18  ;;  %v838_v63 = vsel %vm822_vm8, 0.9, %v1457_v52 }
 0x14c   : > { %v837_v41 = vsel %vm821_vm5, 0.9, %v1457_v52 }
 0x151   : > { %v907_v46 = vpop.permute.xlu1 %906 }
 0x152   : > { %v2226_v8 = vpop.permute.xlu0 %807  ;;  %vm953_vm11 = vcmp.eq.s32.totalorder %v907_v46, 1  ;;  %v742_v46 = vunpack.c.h.bf16 %v2181_v17  ;;  %v853_v17 = vmul.f32 %v837_v41, %v741_v49 }
 0x153   : > { %v969_v9 = vsel %vm953_vm11, %v857_v10, 0.0  ;;  %vm824_vm13 = vcmp.eq.s32.totalorder %v1757_v42, %v2226_v8 }
 0x154   : > { %v985_v50 = vadd.f32 %v970_v15, %v969_v9  ;;  %v854_v43 = vmul.f32 %v838_v63, %v742_v46 }
 0x156   : > { %v870_v45 = vadd.f32 %v854_v43, %v2196_v31 }
 0x159   : > { %v916_v25 = vpop.permute.xlu1 %915 }
 0x15a   : > { %v913_v2 = vpop.permute.xlu0 %912  ;;  %vm956_vm15 = vcmp.eq.s32.totalorder %v916_v25, 1  ;;  %v852_v25 = vmul.f32 %v836_v55, %v740_v28 }
 0x15b   : > { %vm955_vm0 = vcmp.eq.s32.totalorder %v913_v2, 1  ;;  %v972_v19 = vsel %vm956_vm15, %v860_v16, 0.0  ;;  %v937_v16 = vpop.permute.xlu2 %936  ;;  %v869_v2 = vadd.f32 %v853_v17, %v2111_v30 }
 0x15c   : > { %v971_v37 = vsel %vm955_vm0, %v2161_v34, 0.0  ;;  %v737_v34 = vunpack.c.h.bf16 %v2130_v13  ;;  %vm963_vm0 = vcmp.eq.s32.totalorder %v937_v16, 1  ;;  %v868_v8 = vadd.f32 %v852_v25, %v2178_v0 }
 0x15d   : > { %v986_v10 = vadd.f32 %v972_v19, %v971_v37  ;;  %v840_v19 = vsel %vm824_vm13, 0.9, %v1457_v52  ;;  %v867_v37 = vadd.f32 %v851_v20, %v2184_v57  ;;  %v871_v0 = vadd.f32 %v855_v33, %v2193_v27 }
 0x15e   : > { %v849_v21 = vmul.f32 %v833_v51, %v737_v34 }
 0x15f   : > { %v993_v11 = vadd.f32 %v986_v10, %v985_v50 }
 0x160   : > { %v865_v59 = vadd.f32 %v849_v21, %v2156_v22  ;;  %v744_v22 = vunpack.c.h.bf16 %v2105_v5  ;;  %v979_v5 = vsel %vm963_vm0, %v867_v37, 0.0 }
 0x161   : > { %v925_v35 = vpop.permute.xlu1 %924 }
 0x162   : > { %v922_v47 = vpop.permute.xlu0 %921  ;;  %vm959_vm6 = vcmp.eq.s32.totalorder %v925_v35, 1  ;;  %v856_v31 = vmul.f32 %v840_v19, %v744_v22 }
 0x163   : > { %vm958_vm7 = vcmp.eq.s32.totalorder %v922_v47, 1  ;;  %v975_v58 = vsel %vm959_vm6, %v863_v24, 0.0  ;;  %v946_v56 = vpop.permute.xlu2 %945 }
 0x164   : > { %v974_v7 = vsel %vm958_vm7, %v862_v23, 0.0  ;;  %v988_v32 = vadd.f32 %v976_v38, %v975_v58  ;;  %vm966_vm15 = vcmp.eq.s32.totalorder %v946_v56, 1  ;;  %v872_v26 = vadd.f32 %v856_v31, %v2132_v36 }
 0x165   : > { %v987_v4 = vadd.f32 %v974_v7, %v973_v1  ;;  %v982_v42 = vsel %vm966_vm15, %v870_v45, 0.0 }
 0x167   : > { %v994_v13 = vadd.f32 %v988_v32, %v987_v4 }
 0x169   : > { %v997_v15 = vadd.f32 %v994_v13, %v993_v11  ;;  %v934_v9 = vpop.permute.xlu1 %933 }
 0x16a   : > { %v931_v50 = vpop.permute.xlu0 %930  ;;  %vm962_vm11 = vcmp.eq.s32.totalorder %v934_v9, 1 }
 0x16b   : > { %vm961_vm12 = vcmp.eq.s32.totalorder %v931_v50, 1  ;;  %v978_v3 = vsel %vm962_vm11, %v866_v44, 0.0 }
 0x16c   : > { %v977_v53 = vsel %vm961_vm12, %v865_v59, 0.0 }
 0x16d   : > { %v989_v18 = vadd.f32 %v978_v3, %v977_v53 }
 0x171   : > { %v943_v6 = vpop.permute.xlu1 %942 }
 0x172   : > { %v940_v29 = vpop.permute.xlu0 %939  ;;  %vm965_vm1 = vcmp.eq.s32.totalorder %v943_v6, 1 }
 0x173   : > { %vm964_vm2 = vcmp.eq.s32.totalorder %v940_v29, 1  ;;  %v981_v14 = vsel %vm965_vm1, %v869_v2, 0.0 }
 0x174   : > { %v980_v62 = vsel %vm964_vm2, %v868_v8, 0.0  ;;  %v991_v10 = vadd.f32 %v982_v42, %v981_v14 }
 0x175   : > { %v990_v30 = vadd.f32 %v980_v62, %v979_v5 }
 0x177   : > { %v995_v11 = vadd.f32 %v990_v30, %v989_v18 }
 0x179   : > { %v952_v57 = vpop.permute.xlu1 %951 }
 0x17a   : > { %v949_v39 = vpop.permute.xlu0 %948  ;;  %vm968_vm3 = vcmp.eq.s32.totalorder %v952_v57, 1 }
 0x17b   : > { %vm967_vm4 = vcmp.eq.s32.totalorder %v949_v39, 1  ;;  %v984_v52 = vsel %vm968_vm3, %v872_v26, 0.0 }
 0x17c   : > { %v983_v24 = vsel %vm967_vm4, %v871_v0, 0.0 }
 0x17d   : > { %v992_v35 = vadd.f32 %v984_v52, %v983_v24 }
 0x17f   : > { %v996_v34 = vadd.f32 %v992_v35, %v991_v10  ;;  %1002 = sbr.rel (%p1182_p9) target bundleno = 390 (0x186), region = 36 }
 0x181   : > { %v998_v61 = vadd.f32 %v996_v34, %v995_v11 }
 0x183   : > { %v999_v47 = vadd.f32 %v998_v61, %v997_v15 }
 0x184   : > { %v1458_v23 = vmov 0.0  }
 0x185   : > { %1003 = vst [vmem:[%s196_s29] sm:$0xff] %v1458_v23 }
 0x186 PF: > { %s1184_s30 = sshll.u32 %s1439_s16, 3  ;;  %s1020_s8 = sshll.u32 %s196_s29, 4  ;;  %s1021_s8 = int_to_ptr.vmem [resolvable:$true] %s1020_s8 }
 0x187   : > { %s1018_s21 = scalar_lea.hbm %s2338_s2, %s1184_s30  ;;  %s1008_s15 = scalar_lea.sflag [#allocation4], %s194_s7 }
 0x188   : > { %s1022_s26 = sshll.u32 %s1018_s21, 4  ;;  %s1349_s14 = scalar_lea.hbm %s2338_s2, 32  ;;  %s1023_s26 = int_to_ptr.hbm [resolvable:$true] %s1022_s26 }
 0x189   : > { %s1343_s12 = sshra.s32 %s1023_s26, 4  ;;  %s1344_s12 = int_to_ptr.hbm [resolvable:$true] %s1343_s12 }
 0x18a   : > { %s1345_s20 = scalar_lea.hbm %s1344_s12, 8  ;;  %p1350_p0 = scmp.lt.s32.totalorder %s1344_s12, %s2338_s2 }
 0x18b   : > { %p1346_p10 = scmp.ne.s32.totalorder %s1344_s12, %s1345_s20  ;;  %p1351_p1 = scmp.lt.s32.totalorder %s1349_s14, %s1345_s20 }
 0x18c   : > { %v1004_v36 = vld [vmem:[%s196_s29] sm:$0xff] }
 0x18d   : > { %v1005_v27 = vadd.f32 %v1004_v36, %v999_v47  ;;  %p1347_p11 = pnand %p1346_p10, %p1556_p12  ;;  %p1352_p4 = por %p1351_p1, %p1350_p0 }
 0x18f   : > { %1006 = vst [vmem:[%s196_s29] sm:$0xff] %v1005_v27  ;;  %p1348_p13 = pneg %p1347_p11 }
 0x191   : > { %p1353_p5 = pnand %p1352_p4, %p1348_p13 }
 0x193   : > { %1356 = shalt.err (!%p1353_p5)
}
 0x194   : > { %1190 = dma.vmem_to_hbm [thread:$0]  (%p1556_p12), %s1021_s8, 128, %s1023_s26, %s1008_s15  }
 0x195 PF: > { %p1201_p6 = scmp.ge.s32.totalorder %s1451_s19, 2  ;;  %s1034_s4 = sand.u32 1, %s1411_s9  }
 0x196   : > { %s1035_s28 = scalar_lea.sflag [#allocation4], %s1034_s4 }
 0x197   : > { %p1197_p8 = pnand %p1201_p6, %p1569_p2 }
 0x199   : > { %p1198_p3 = pneg %p1197_p8 }
 0x19b   : > { %1406 = dma.done.wait (%p1198_p3), %s1035_s28, 128  }
 0x19c   : > { %1408 = vsyncadd (%p1198_p3), %s1035_s28, 4294967168  ;;  %s18_s19 = sadd.s32 1, %s1451_s19   ;;  %s2355_s5 = sld [smem:[#allocation12_spill]] }
 0x19d   : > { %p15_p7 = scmp.ge.s32.totalorder %s18_s19, 10   ;;  %s2356_s3 = sld [smem:[#allocation8_spill]] }
 0x19e   : > { %s2357_s14 = sld [smem:[#allocation13_spill]]  ;;  %s2361_s9 = smov %s1415_s10 }
 0x19f   : > { %s2358_s15 = sld [smem:[#allocation9_spill]]  ;;  %s2362_s10 = smov %s1419_s11 }
 0x1a0   : > { %s2359_s17 = sld [smem:[#allocation10_spill]]  ;;  %s2364_s12 = smov %s1427_s13 }
 0x1a1   : > { %s2360_s7 = sld [smem:[#allocation11_spill]]  ;;  %s2366_s16 = smov %s1447_s18 }
 0x1a2   : > { %s2363_s11 = smov %s2355_s5 }
 0x1a3   : > { %s2365_s13 = smov %s2356_s3  ;;  %17 = sbr.rel (!%p15_p7) target bundleno = 9 (0x9), region = 80 }
 0x1a7   : > { %s2367_s18 = smov %s2360_s7 }
 0x1a8   :  { %1041 = vsyncpa [#allocation3], 1 }
 0x1a9   :  { %1043 = vsyncpa [#allocation3 + $0x1], 1 }
 0x1aa   :  { %1044 = vsyncpa [#allocation4], 1 }
 0x1ab   :  { %1046 = vsyncpa [#allocation4 + $0x1], 1 }

</bundles_post_ra>
